<compile_context>
chip_gen: v7x
topology: tpu7x:2x2x1
jax: 0.10.0
libtpu: 0.0.40
codegen_flags: <defaults>
</compile_context>

<pallas_src>
import functools
import math

import jax
import jax.numpy as jnp
from jax import lax
from jax.experimental import pallas as pl
from jax.experimental.pallas import tpu as pltpu

# Finite "minus infinity": safe under online-softmax rescaling (a fully masked chunk
# contributes exp(-1e30 - m) == 0) and never produces NaNs the way true -inf can.
_NEG_BIG = -1e30


def _mha_kernel(x_ref, wqkv_ref, bqkv_ref, wout_t_ref, bout_ref, o_ref, vals_ref,
                *, num_heads, head_dim, kv_chunk, causal_mask):
    h = pl.program_id(1)
    H = num_heads
    hd = head_dim

    x = x_ref[0]                                   # (S, d_model), compute dtype
    S = x.shape[0]
    d_model = x.shape[1]
    cdt = x.dtype                                  # compute dtype for MXU inputs

    # ---- per-head QKV projection (weights pre-transposed & pre-sliced on host) ----
    qkv = jnp.dot(x, wqkv_ref[0], preferred_element_type=jnp.float32)
    qkv = qkv + bqkv_ref[0]                        # (S, 3*hd) f32, bias (1, 3*hd)

    inv_sqrt_dk = 1.0 / math.sqrt(hd)
    q = (qkv[:, :hd] * inv_sqrt_dk).astype(cdt)    # pre-scale q (cheaper than scores)
    k = qkv[:, hd:2 * hd].astype(cdt)
    v = qkv[:, 2 * hd:3 * hd].astype(cdt)

    num_chunks = S // kv_chunk                     # host guarantees kv_chunk | S
    if causal_mask:
        row_ids = lax.broadcasted_iota(jnp.int32, (S, kv_chunk), 0)
        col_ids = lax.broadcasted_iota(jnp.int32, (S, kv_chunk), 1)

    # ---- online softmax over KV chunks (single chunk == plain softmax) ----
    m_i = jnp.full((S, 1), -jnp.inf, dtype=jnp.float32)
    l_i = jnp.zeros((S, 1), dtype=jnp.float32)
    acc = jnp.zeros((S, hd), dtype=jnp.float32)
    for c in range(num_chunks):                    # static trip count
        k_c = k[c * kv_chunk:(c + 1) * kv_chunk, :]
        v_c = v[c * kv_chunk:(c + 1) * kv_chunk, :]
        # q @ k_c^T as an NT dot (contract last dims) -> no XLU transpose of k.
        s_c = lax.dot_general(q, k_c, (((1,), (1,)), ((), ())),
                              preferred_element_type=jnp.float32)   # (S, kv_chunk)
        if causal_mask:
            s_c = jnp.where(col_ids + c * kv_chunk > row_ids,
                            jnp.float32(_NEG_BIG), s_c)
        m_new = jnp.maximum(m_i, jnp.max(s_c, axis=-1, keepdims=True))
        alpha = jnp.exp(m_i - m_new)
        p = jnp.exp(s_c - m_new)
        l_i = alpha * l_i + jnp.sum(p, axis=-1, keepdims=True)
        acc = alpha * acc + jnp.dot(p.astype(cdt), v_c,
                                    preferred_element_type=jnp.float32)
        m_i = m_new

    # EUP reciprocal (free slot) + one Newton step on the (S, 1) vector.
    r = pl.reciprocal(l_i, approx=True)
    r = r * (2.0 - l_i * r)
    head_out = acc * r                             # (S, hd) f32

    # Stage this head's output at rows [h*S, (h+1)*S) of the (H*S, hd) scratch.
    # Row-major, this staging buffer is exactly torch's
    # values.reshape(B, S, d_model) (the module does NOT permute heads back).
    vals_ref[pl.ds(h * S, S), :] = head_out

    @pl.when(h == H - 1)
    def _finalize():
        acc_o = jnp.zeros((S, d_model), dtype=jnp.float32)
        for j in range(H):                         # static loop over column chunks
            # Row r of this stride-H view is flat row r*H + j, i.e. the j-th hd-wide
            # chunk of output row r of the scrambled (S, d_model) values matrix.
            vals_j = vals_ref[pl.ds(j, S, stride=H), :].astype(cdt)   # (S, hd)
            w_j = wout_t_ref[j * hd:(j + 1) * hd, :]                  # (hd, d_model)
            acc_o = acc_o + jnp.dot(vals_j, w_j,
                                    preferred_element_type=jnp.float32)
        o_ref[0] = (acc_o + bout_ref[...]).astype(o_ref.dtype)


def _pick_kv_chunk(seq_len, preferred=1024):
    if seq_len <= preferred:
        return seq_len
    for cand in (preferred, 512, 256, 128):
        if seq_len % cand == 0:
            return cand
    return seq_len


def multihead_attention(x, wqkv, bqkv, wout, bout, *, num_heads, mask=False,
                        compute_dtype=None):
    """Forward pass of the PyTorch MultiheadAttention module.

    x: (B, S, d_model); wqkv: (3*d_model, d_model); bqkv: (3*d_model,);
    wout: (d_model, d_model); bout: (d_model,)   (nn.Linear convention y = x@W.T+b).
    compute_dtype: dtype for MXU matmul inputs (e.g. jnp.bfloat16); accumulation is
    always f32.  Defaults to x.dtype.
    """
    B, S, d_model = x.shape
    H = num_heads
    hd = d_model // H
    cdt = x.dtype if compute_dtype is None else compute_dtype
    kv_chunk = _pick_kv_chunk(S)

    # Host-side, one-time weight preprocessing (no in-kernel transposes):
    #   head h's QKV projection = rows [h*3*hd, (h+1)*3*hd) of wqkv, transposed to
    #   (d_model, 3*hd) so the kernel computes x @ W_h directly.
    wqkv_ph = jnp.transpose(wqkv.reshape(H, 3 * hd, d_model), (0, 2, 1)).astype(cdt)
    bqkv_ph = bqkv.reshape(H, 1, 3 * hd).astype(jnp.float32)
    wout_t = jnp.transpose(wout).astype(cdt)          # (d_model, d_model), y = v @ wout.T
    bout2 = bout.reshape(1, d_model).astype(jnp.float32)
    x_c = x.astype(cdt)

    kernel = functools.partial(_mha_kernel, num_heads=H, head_dim=hd,
                               kv_chunk=kv_chunk, causal_mask=mask)

    return pl.pallas_call(
        kernel,
        out_shape=jax.ShapeDtypeStruct((B, S, d_model), x.dtype),
        grid_spec=pltpu.PrefetchScalarGridSpec(
            num_scalar_prefetch=0,
            grid=(B, H),   # head axis last: scratch accumulation / finalize axis
            in_specs=[
                pl.BlockSpec((1, S, d_model), lambda b, h: (b, 0, 0)),        # x
                pl.BlockSpec((1, d_model, 3 * hd), lambda b, h: (h, 0, 0)),   # Wqkv_h
                pl.BlockSpec((1, 1, 3 * hd), lambda b, h: (h, 0, 0)),         # bqkv_h
                pl.BlockSpec((d_model, d_model), lambda b, h: (0, 0)),        # wout.T
                pl.BlockSpec((1, d_model), lambda b, h: (0, 0)),              # bout
            ],
            out_specs=pl.BlockSpec((1, S, d_model), lambda b, h: (b, 0, 0)),
            scratch_shapes=[pltpu.VMEM((H * S, hd), jnp.float32)],   # staged head outs
        ),
        compiler_params=pltpu.CompilerParams(
            dimension_semantics=("parallel", "arbitrary"),
        ),
    )(x_c, wqkv_ph, bqkv_ph, wout_t, bout2)


def _reference(x, wqkv, bqkv, wout, bout, *, num_heads, mask=False):
    """Pure-JAX reference, faithful to the PyTorch module (including its reshape of
    (B, H, S, hd) -> (B, S, d_model) WITHOUT permuting heads back)."""
    B, S, d_model = x.shape
    hd = d_model // num_heads
    qkv = jnp.einsum("bsd,ed->bse", x, wqkv) + bqkv
    qkv = qkv.reshape(B, S, num_heads, 3 * hd).transpose(0, 2, 1, 3)
    q, k, v = jnp.split(qkv, 3, axis=-1)
    scaled = jnp.einsum("bhqd,bhkd->bhqk", q, k) / math.sqrt(hd)
    if mask:
        causal = jnp.triu(jnp.full((S, S), -jnp.inf, dtype=scaled.dtype), k=1)
        scaled = scaled + causal
    attn = jax.nn.softmax(scaled, axis=-1)
    vals = jnp.einsum("bhqk,bhkd->bhqd", attn, v)     # (B, H, S, hd)
    vals = vals.reshape(B, S, d_model)                # module quirk: no transpose
    return jnp.einsum("bsd,ed->bse", vals, wout) + bout


if __name__ == "__main__":
    B, S, d_model, num_heads = 2, 8, 32, 4

    key = jax.random.PRNGKey(0)
    kx, kw1, kb1, kw2, kb2 = jax.random.split(key, 5)

    x = jax.random.normal(kx, (B, S, d_model), dtype=jnp.float32)
    # Deterministic "nn.Linear"-style params (synthetic, no checkpoint load).
    lim = 1.0 / math.sqrt(d_model)
    wqkv = jax.random.uniform(kw1, (3 * d_model, d_model), jnp.float32, -lim, lim)
    bqkv = jax.random.uniform(kb1, (3 * d_model,), jnp.float32, -lim, lim)
    wout = jax.random.uniform(kw2, (d_model, d_model), jnp.float32, -lim, lim)
    bout = jax.random.uniform(kb2, (d_model,), jnp.float32, -lim, lim)

    ref = _reference(x, wqkv, bqkv, wout, bout, num_heads=num_heads, mask=False)
    ref_m = _reference(x, wqkv, bqkv, wout, bout, num_heads=num_heads, mask=True)

    # f32 compute path, no mask.
    out = jax.block_until_ready(
        multihead_attention(x, wqkv, bqkv, wout, bout,
                            num_heads=num_heads, mask=False))
    assert out.shape == (B, S, d_model)
    assert jnp.allclose(out, ref, atol=1e-3, rtol=1e-3)

    # f32 compute path, causal mask branch.
    out_m = jax.block_until_ready(
        multihead_attention(x, wqkv, bqkv, wout, bout,
                            num_heads=num_heads, mask=True))
    assert jnp.allclose(out_m, ref_m, atol=1e-3, rtol=1e-3)

    # bf16-compute path (MXU-friendly inputs, f32 accumulation).
    out_bf16 = jax.block_until_ready(
        multihead_attention(x, wqkv, bqkv, wout, bout,
                            num_heads=num_heads, mask=False,
                            compute_dtype=jnp.bfloat16))
    assert jnp.allclose(out_bf16, ref, atol=1e-1, rtol=1e-1)

    print("KERNEL_OK")
</pallas_src>

<mosaic_0001>
module attributes {stable_mosaic.version = 11 : i64} {
  func.func @_mha_kernel(%arg0: i32, %arg1: i32, %arg2: memref<1x8x32xf32, #tpu.memory_space<vmem>>, %arg3: memref<1x32x24xf32, #tpu.memory_space<vmem>>, %arg4: memref<1x1x24xf32, #tpu.memory_space<vmem>>, %arg5: memref<32x32xf32, #tpu.memory_space<vmem>>, %arg6: memref<1x32xf32, #tpu.memory_space<vmem>>, %arg7: memref<1x8x32xf32, #tpu.memory_space<vmem>>, %arg8: memref<32x8xf32, #tpu.memory_space<vmem>>) attributes {dimension_semantics = [#tpu.dimension_semantics<parallel>, #tpu.dimension_semantics<arbitrary>], iteration_bounds = array<i64: 2, 4>, scalar_prefetch = 0 : i64, scratch_operands = 1 : i64, tpu.core_type = #tpu.core_type<tc>, window_params = [{transform_indices = @transform_0, window_bounds = array<i64: 1, 8, 32>}, {transform_indices = @transform_1, window_bounds = array<i64: 1, 32, 24>}, {transform_indices = @transform_2, window_bounds = array<i64: 1, 1, 24>}, {pipeline_mode = #tpu.pipeline_mode<synchronous>, transform_indices = @transform_3, window_bounds = array<i64: 32, 32>}, {pipeline_mode = #tpu.pipeline_mode<synchronous>, transform_indices = @transform_4, window_bounds = array<i64: 1, 32>}, {transform_indices = @transform_5, window_bounds = array<i64: 1, 8, 32>}]} {
    %c0 = arith.constant 0 : index
    %c0_0 = arith.constant 0 : index
    %c0_1 = arith.constant 0 : index
    %0 = vector.load %arg2[%c0, %c0_0, %c0_1] : memref<1x8x32xf32, #tpu.memory_space<vmem>>, vector<1x8x32xf32>
    %1 = vector.shape_cast %0 : vector<1x8x32xf32> to vector<8x32xf32>
    %c0_2 = arith.constant 0 : index
    %c0_3 = arith.constant 0 : index
    %c0_4 = arith.constant 0 : index
    %2 = vector.load %arg3[%c0_2, %c0_3, %c0_4] : memref<1x32x24xf32, #tpu.memory_space<vmem>>, vector<1x32x24xf32>
    %3 = vector.shape_cast %2 : vector<1x32x24xf32> to vector<32x24xf32>
    %cst = arith.constant dense<0.000000e+00> : vector<8x24xf32>
    %4 = tpu.matmul %1, %3, %cst {dimension_numbers = #tpu.dot_dimension_numbers<[1], [0], [0], [1], [0, 0, 1, 1], [], []>} : vector<8x32xf32>, vector<32x24xf32>, vector<8x24xf32> -> vector<8x24xf32>
    %c0_5 = arith.constant 0 : index
    %c0_6 = arith.constant 0 : index
    %c0_7 = arith.constant 0 : index
    %5 = vector.load %arg4[%c0_5, %c0_6, %c0_7] : memref<1x1x24xf32, #tpu.memory_space<vmem>>, vector<1x1x24xf32>
    %6 = vector.shape_cast %5 : vector<1x1x24xf32> to vector<1x24xf32>
    %7 = vector.broadcast %6 : vector<1x24xf32> to vector<8x24xf32>
    %8 = arith.addf %4, %7 : vector<8x24xf32>
    %9 = vector.extract_strided_slice %8 {offsets = [0, 0], sizes = [8, 8], strides = [1, 1]} : vector<8x24xf32> to vector<8x8xf32>
    %cst_8 = arith.constant 0.353553385 : f32
    %10 = vector.broadcast %cst_8 : f32 to vector<8x8xf32>
    %11 = arith.mulf %9, %10 : vector<8x8xf32>
    %12 = vector.extract_strided_slice %8 {offsets = [0, 8], sizes = [8, 8], strides = [1, 1]} : vector<8x24xf32> to vector<8x8xf32>
    %13 = vector.extract_strided_slice %8 {offsets = [0, 16], sizes = [8, 8], strides = [1, 1]} : vector<8x24xf32> to vector<8x8xf32>
    %cst_9 = arith.constant 0xFF800000 : f32
    %14 = vector.broadcast %cst_9 : f32 to vector<8x1xf32>
    %cst_10 = arith.constant 0.000000e+00 : f32
    %15 = vector.broadcast %cst_10 : f32 to vector<8x1xf32>
    %cst_11 = arith.constant 0.000000e+00 : f32
    %16 = vector.broadcast %cst_11 : f32 to vector<8x8xf32>
    %cst_12 = arith.constant dense<0.000000e+00> : vector<8x8xf32>
    %17 = tpu.matmul %11, %12, %cst_12 {dimension_numbers = #tpu.dot_dimension_numbers<[1], [1], [0], [0], [0, 0, 1, 0], [], []>} : vector<8x8xf32>, vector<8x8xf32>, vector<8x8xf32> -> vector<8x8xf32>
    %cst_13 = arith.constant dense<0xFF800000> : vector<8xf32>
    %18 = vector.multi_reduction <maximumf>, %17, %cst_13 [1] : vector<8x8xf32> to vector<8xf32>
    %19 = vector.shape_cast %18 : vector<8xf32> to vector<8x1xf32>
    %20 = arith.maximumf %14, %19 : vector<8x1xf32>
    %21 = arith.subf %14, %20 : vector<8x1xf32>
    %22 = math.exp %21 : vector<8x1xf32>
    %23 = vector.broadcast %20 : vector<8x1xf32> to vector<8x8xf32>
    %24 = arith.subf %17, %23 : vector<8x8xf32>
    %25 = math.exp %24 : vector<8x8xf32>
    %26 = arith.mulf %22, %15 : vector<8x1xf32>
    %cst_14 = arith.constant dense<0.000000e+00> : vector<8xf32>
    %27 = vector.multi_reduction <add>, %25, %cst_14 [1] : vector<8x8xf32> to vector<8xf32>
    %28 = vector.shape_cast %27 : vector<8xf32> to vector<8x1xf32>
    %29 = arith.addf %26, %28 : vector<8x1xf32>
    %30 = vector.broadcast %22 : vector<8x1xf32> to vector<8x8xf32>
    %31 = arith.mulf %30, %16 : vector<8x8xf32>
    %cst_15 = arith.constant dense<0.000000e+00> : vector<8x8xf32>
    %32 = tpu.matmul %25, %13, %cst_15 {dimension_numbers = #tpu.dot_dimension_numbers<[1], [0], [0], [1], [0, 0, 1, 1], [], []>} : vector<8x8xf32>, vector<8x8xf32>, vector<8x8xf32> -> vector<8x8xf32>
    %33 = arith.addf %31, %32 : vector<8x8xf32>
    %34 = tpu.reciprocal %29 {approx = true} : vector<8x1xf32> -> vector<8x1xf32>
    %35 = arith.mulf %29, %34 : vector<8x1xf32>
    %cst_16 = arith.constant 2.000000e+00 : f32
    %36 = vector.broadcast %cst_16 : f32 to vector<8x1xf32>
    %37 = arith.subf %36, %35 : vector<8x1xf32>
    %38 = arith.mulf %34, %37 : vector<8x1xf32>
    %39 = vector.broadcast %38 : vector<8x1xf32> to vector<8x8xf32>
    %40 = arith.mulf %33, %39 : vector<8x8xf32>
    %c8_i32 = arith.constant 8 : i32
    %41 = arith.muli %arg1, %c8_i32 : i32
    %42 = arith.index_cast %41 : i32 to index
    %c0_17 = arith.constant 0 : index
    %43 = vector.load %arg8[%42, %c0_17] : memref<32x8xf32, #tpu.memory_space<vmem>>, vector<8x8xf32>
    tpu.vector_store %arg8[%42, %c0_17], %40 {strides = array<i32>} : memref<32x8xf32, #tpu.memory_space<vmem>>, vector<8x8xf32>,
    %c3_i32 = arith.constant 3 : i32
    %44 = arith.cmpi eq, %arg1, %c3_i32 : i32
    %45 = arith.extui %44 : i1 to i32
    %c0_i32 = arith.constant 0 : i32
    %46 = arith.cmpi ne, %45, %c0_i32 : i32
    scf.if %46 {
      %cst_18 = arith.constant 0.000000e+00 : f32
      %47 = vector.broadcast %cst_18 : f32 to vector<8x32xf32>
      %c0_19 = arith.constant 0 : index
      %c0_20 = arith.constant 0 : index
      %48 = tpu.strided_load %arg8[%c0_19, %c0_20] {strides = array<i32: 4, 1>} : memref<32x8xf32, #tpu.memory_space<vmem>>, vector<8x8xf32>
      %c0_21 = arith.constant 0 : index
      %c0_22 = arith.constant 0 : index
      %49 = vector.load %arg5[%c0_21, %c0_22] : memref<32x32xf32, #tpu.memory_space<vmem>>, vector<8x32xf32>
      %cst_23 = arith.constant dense<0.000000e+00> : vector<8x32xf32>
      %50 = tpu.matmul %48, %49, %cst_23 {dimension_numbers = #tpu.dot_dimension_numbers<[1], [0], [0], [1], [0, 0, 1, 1], [], []>} : vector<8x8xf32>, vector<8x32xf32>, vector<8x32xf32> -> vector<8x32xf32>
      %51 = arith.addf %47, %50 : vector<8x32xf32>
      %c1 = arith.constant 1 : index
      %c0_24 = arith.constant 0 : index
      %52 = tpu.strided_load %arg8[%c1, %c0_24] {strides = array<i32: 4, 1>} : memref<32x8xf32, #tpu.memory_space<vmem>>, vector<8x8xf32>
      %c8 = arith.constant 8 : index
      %c0_25 = arith.constant 0 : index
      %53 = vector.load %arg5[%c8, %c0_25] : memref<32x32xf32, #tpu.memory_space<vmem>>, vector<8x32xf32>
      %cst_26 = arith.constant dense<0.000000e+00> : vector<8x32xf32>
      %54 = tpu.matmul %52, %53, %cst_26 {dimension_numbers = #tpu.dot_dimension_numbers<[1], [0], [0], [1], [0, 0, 1, 1], [], []>} : vector<8x8xf32>, vector<8x32xf32>, vector<8x32xf32> -> vector<8x32xf32>
      %55 = arith.addf %51, %54 : vector<8x32xf32>
      %c2 = arith.constant 2 : index
      %c0_27 = arith.constant 0 : index
      %56 = tpu.strided_load %arg8[%c2, %c0_27] {strides = array<i32: 4, 1>} : memref<32x8xf32, #tpu.memory_space<vmem>>, vector<8x8xf32>
      %c16 = arith.constant 16 : index
      %c0_28 = arith.constant 0 : index
      %57 = vector.load %arg5[%c16, %c0_28] : memref<32x32xf32, #tpu.memory_space<vmem>>, vector<8x32xf32>
      %cst_29 = arith.constant dense<0.000000e+00> : vector<8x32xf32>
      %58 = tpu.matmul %56, %57, %cst_29 {dimension_numbers = #tpu.dot_dimension_numbers<[1], [0], [0], [1], [0, 0, 1, 1], [], []>} : vector<8x8xf32>, vector<8x32xf32>, vector<8x32xf32> -> vector<8x32xf32>
      %59 = arith.addf %55, %58 : vector<8x32xf32>
      %c3 = arith.constant 3 : index
      %c0_30 = arith.constant 0 : index
      %60 = tpu.strided_load %arg8[%c3, %c0_30] {strides = array<i32: 4, 1>} : memref<32x8xf32, #tpu.memory_space<vmem>>, vector<8x8xf32>
      %c24 = arith.constant 24 : index
      %c0_31 = arith.constant 0 : index
      %61 = vector.load %arg5[%c24, %c0_31] : memref<32x32xf32, #tpu.memory_space<vmem>>, vector<8x32xf32>
      %cst_32 = arith.constant dense<0.000000e+00> : vector<8x32xf32>
      %62 = tpu.matmul %60, %61, %cst_32 {dimension_numbers = #tpu.dot_dimension_numbers<[1], [0], [0], [1], [0, 0, 1, 1], [], []>} : vector<8x8xf32>, vector<8x32xf32>, vector<8x32xf32> -> vector<8x32xf32>
      %63 = arith.addf %59, %62 : vector<8x32xf32>
      %c0_33 = arith.constant 0 : index
      %c0_34 = arith.constant 0 : index
      %64 = vector.load %arg6[%c0_33, %c0_34] : memref<1x32xf32, #tpu.memory_space<vmem>>, vector<1x32xf32>
      %65 = vector.broadcast %64 : vector<1x32xf32> to vector<8x32xf32>
      %66 = arith.addf %63, %65 : vector<8x32xf32>
      %c0_35 = arith.constant 0 : index
      %c0_36 = arith.constant 0 : index
      %c0_37 = arith.constant 0 : index
      %67 = vector.load %arg7[%c0_35, %c0_36, %c0_37] : memref<1x8x32xf32, #tpu.memory_space<vmem>>, vector<1x8x32xf32>
      %68 = vector.shape_cast %67 : vector<1x8x32xf32> to vector<8x32xf32>
      %69 = vector.shape_cast %66 : vector<8x32xf32> to vector<1x8x32xf32>
      tpu.vector_store %arg7[%c0_35, %c0_36, %c0_37], %69 {strides = array<i32>} : memref<1x8x32xf32, #tpu.memory_space<vmem>>, vector<1x8x32xf32>,
    } else {
    }
    return
  }
  func.func @transform_0(%arg0: i32, %arg1: i32) -> (i32, i32, i32) {
    %c0_i32 = arith.constant 0 : i32
    %c0_i32_0 = arith.constant 0 : i32
    %c0_i32_1 = arith.constant 0 : i32
    return %arg0, %c0_i32, %c0_i32_0 : i32, i32, i32
  }
  func.func @transform_1(%arg0: i32, %arg1: i32) -> (i32, i32, i32) {
    %c0_i32 = arith.constant 0 : i32
    %c0_i32_0 = arith.constant 0 : i32
    %c0_i32_1 = arith.constant 0 : i32
    return %arg1, %c0_i32, %c0_i32_0 : i32, i32, i32
  }
  func.func @transform_2(%arg0: i32, %arg1: i32) -> (i32, i32, i32) {
    %c0_i32 = arith.constant 0 : i32
    %c0_i32_0 = arith.constant 0 : i32
    %c0_i32_1 = arith.constant 0 : i32
    return %arg1, %c0_i32, %c0_i32_0 : i32, i32, i32
  }
  func.func @transform_3(%arg0: i32, %arg1: i32) -> (i32, i32) {
    %c0_i32 = arith.constant 0 : i32
    %c0_i32_0 = arith.constant 0 : i32
    %c0_i32_1 = arith.constant 0 : i32
    return %c0_i32, %c0_i32_0 : i32, i32
  }
  func.func @transform_4(%arg0: i32, %arg1: i32) -> (i32, i32) {
    %c0_i32 = arith.constant 0 : i32
    %c0_i32_0 = arith.constant 0 : i32
    %c0_i32_1 = arith.constant 0 : i32
    return %c0_i32, %c0_i32_0 : i32, i32
  }
  func.func @transform_5(%arg0: i32, %arg1: i32) -> (i32, i32, i32) {
    %c0_i32 = arith.constant 0 : i32
    %c0_i32_0 = arith.constant 0 : i32
    %c0_i32_1 = arith.constant 0 : i32
    return %arg0, %c0_i32, %c0_i32_0 : i32, i32, i32
  }
}

</mosaic_0001>

<bundles_post_ra>
// kernel: tpu_custom_call.1
= control target key start
LH: loop header
LB: loop body
LE: loop exit
PB: predicated region body
PF: predicated region fallthrough
CT: control target
= control target key end

     0   :  { %10 = vsyncpa [#allocation4], 0  ;;  %s1445_s0 = inlined_call_operand.vmem [shape: f32[2,8,32], index: 0, kind: input, shape index: {}]   ;;  %s1446_s1 = inlined_call_operand.vmem [shape: f32[4,32,24], index: 1, kind: input, shape index: {}]   ;;  %s1447_s2 = inlined_call_operand.vmem [shape: f32[4,1,24], index: 2, kind: input, shape index: {}]   ;;  %s1448_s3 = inlined_call_operand.vmem [shape: f32[32,32], index: 3, kind: input, shape index: {}]   ;;  %s1449_s4 = inlined_call_operand.vmem [shape: f32[1,32], index: 4, kind: input, shape index: {}]   ;;  %s1450_s5 = inlined_call_operand.hbm [shape: f32[2,8,32], index: 5, kind: output, shape index: {}]  }
   0x1   :  { %12 = vsyncpa [#allocation4 + $0x1], 0  ;;  %s1264_s18 = smov 0   ;;  %s1266_s19 = smov 0  }
   0x2   :  { %s1268_s20 = smov 0   ;;  %s1270_s21 = smov 0  }
   0x3   :  { %s1272_s22 = smov 0   ;;  %s1274_s23 = smov 0  }
   0x4   :  { %s1276_s24 = smov 0   ;;  %s1278_s25 = smov 0  }
   0x5 LB: > { %s956_s26 = sadd.s32 4294967295, %s1224_s25   ;;  %s957_s27 = sadd.s32 4294967294, %s1224_s25   ;;  %s1224_s25 = sphi %s1278_s25, %s18_s25   ;;  %s1220_s24 = sphi %s1276_s24, %s1459_s24   ;;  %s1216_s23 = sphi %s1274_s23, %s1458_s23   ;;  %s1212_s22 = sphi %s1272_s22, %s1457_s22   ;;  %s1208_s21 = sphi %s1270_s21, %s1456_s21   ;;  %s1204_s20 = sphi %s1268_s20, %s1455_s20   ;;  %s1200_s19 = sphi %s1266_s19, %s1454_s19   ;;  %s1196_s18 = sphi %s1264_s18, %s1453_s18  }
   0x6   : > { %s27_s28 = sadd.s32 1, %s1216_s23  ;;  %s30_s29 = sadd.s32 1, %s1220_s24 }
   0x7   : > { %p28_p0 = scmp.ge.s32.totalorder %s27_s28, 4  ;;  %p167_p1 = scmp.ne.s32.totalorder %s1204_s20, %s1200_s19 }
   0x8   : > { %p168_p2 = scmp.eq.s32.totalorder %s956_s26, 7  ;;  %p173_p4 = scmp.ne.s32.totalorder %s1200_s19, %s1196_s18 }
   0x9   : > { %s1461_s28 = smov (%p28_p0, %s27_s28), 0  ;;  %s1463_s29 = smov (!%p28_p0, %s30_s29), %s1220_s24 }
   0xa   : > { %p1313_p3 = por %p168_p2, %p167_p1  ;;  %p32_p5 = scmp.ge.s32.totalorder %s1463_s29, 2 }
   0xb   : > { %p174_p6 = scmp.eq.s32.totalorder %s957_s27, 7  ;;  %p960_p7 = scmp.ge.s32.totalorder %s1224_s25, 1 }
   0xc   : > { %p219_p8 = scmp.lt.s32.totalorder %s1224_s25, 9  ;;  %s1465_s29 = smov (%p32_p5, %s1463_s29), 0 }
   0xd   : > { %p1323_p9 = por %p174_p6, %p173_p4  ;;  %s154_s7 = ssub.s32 %s1220_s24, %s1465_s29 }
   0xe   : > { %p220_p10 = pnand %p960_p7, %p219_p8  ;;  %s157_s8 = sadd.s32 1, %s1204_s20 }
   0xf   : > { %p155_p11 = scmp.eq.s32.totalorder %s154_s7, 0  ;;  %s251_s10 = sand.u32 (!%p220_p10), 1, %s1200_s19   ;;  %v1226_v0 = vmov (!%p220_p10), 0.0|0.0   ;;  %vm1227_vm0 = vmmov (!%p220_p10), 0   ;;  %v1228_v1 = vmov (!%p220_p10), 0.0   ;;  %vm278_vm1 = vcmask (!%p220_p10), 261120  }
  0x10   : > { %223 = sbr.rel (%p220_p10) target bundleno = 1210 (0x4ba), region = 40  ;;  %p258_p12 = scmp.lt.s32.totalorder (!%p220_p10), %s1208_s21, 3  ;;  %1040 = vmatprep.subr.bf16.mxu0 (!%p220_p10), %v1226_v0  ;;  %1007 = vmatprep.mubr.msk.f32.mxu0 (!%p220_p10), %vm1227_vm0, %v1228_v1  ;;  %vm356_vm2 = vcmask (!%p220_p10), 64512  }
  0x11   : > { %s1331_s9 = scalar_select %p155_p11, %s1204_s20, %s157_s8  }
  0x12   : > { %s1337_s11 = sshll.u32 (!%p220_p10), %s251_s10, 3  ;;  %p254_p13 = scmp.lt.s32.totalorder (!%p220_p10), %s1212_s22, 1  ;;  %1010 = vmatprep.subr.mxu1 (!%p220_p10), %v1228_v1  ;;  %1012 = vmatprep.mubr.msk.f32.mxu1 (!%p220_p10), %vm1227_vm0, %v1228_v1 }
  0x13   : > { %s253_s27 = scalar_lea.vmem (!%p220_p10), [#allocation3], %s1337_s11  ;;  %p971_p0 = scmp.ne.s32.totalorder (!%p220_p10), %s1208_s21, 3 }
  0x17   : > { %s259_s12 = scalar_select %p258_p12, %s1208_s21, 3 }
  0x18   : > { %s255_s13 = scalar_select %p254_p13, %s1212_s22, 1 }
  0x19   : > { %s981_s14 = sshll.u32 %s259_s12, 5  ;;  %s265_s16 = scalar_lea.vmem %s1447_s2, %s259_s12  ;;  %v539_v38 = vld [vmem:[%s1448_s3 + $0x8] sm:$0xff] (!%p971_p0)  ;;  %v536_v40 = vld [vmem:[%s1448_s3] sm:$0xff] (!%p971_p0)  ;;  %v1231_v41 = vmov (!%p971_p0), 0.0   ;;  %vm1232_vm3 = vmmov (!%p971_p0), 0   ;;  %v688_v43 = vld [vmem:[%s1448_s3 + $0x10] sm:$0xff] (!%p971_p0) }
  0x1a   : > { %s262_s17 = scalar_lea.vmem %s1446_s1, %s981_s14  ;;  %s962_s26 = sshll.u32 %s255_s13, 3  ;;  %v965_v9 = vld [vmem:[%s265_s16] ss:$0 sm:$0xff]  ;;  %v765_v44 = vld [vmem:[%s1448_s3 + $0x18] sm:$0xff] (!%p971_p0) }
  0x1b   : > { %v267_v2 = vld [vmem:[%s262_s17] sm:$0xff]  ;;  %v268_v3 = vld [vmem:[%s262_s17 + $0x8] sm:$0xff]  ;;  %v269_v4 = vld [vmem:[%s262_s17 + $0x10] sm:$0xff]  ;;  %s257_s8 = scalar_lea.vmem %s1445_s0, %s962_s26  ;;  %s1229_s13 = smov 112  }
  0x1c   : > { %v1041_v5 = vpack.c.bf16 %v268_v3, %v267_v2  ;;  %v270_v6 = vld [vmem:[%s262_s17 + $0x18] sm:$0xff]  ;;  %v266_v8 = vld [vmem:[%s257_s8] sm:$0xff]  ;;  %s1230_s17 = smov 120   ;;  %s970_s12 = sshll.u32 %s1208_s21, 3 }
  0x1d   : > { %v1044_v7 = vpack.c.bf16 %v270_v6, %v269_v4  ;;  %s529_s26 = scalar_lea.vmem [#allocation2], %s970_s12  ;;  %v976_v56 = vld [vmem:[%s1449_s4] ss:$0 sm:$0xff] (!%p971_p0) }
  0x1e   : > { %1042 = vmatpush3.bf16.msra.mxu0 %v1041_v5 }
  0x1f   : > { %1043 = vmatprep.subr.bf16.mxu0 %v1226_v0 }
  0x22   : > { %1045 = vmatpush3.bf16.msra.mxu0 %v1044_v7 }
  0x23   : > { %1020 = vmatprep.subr.mxu0 (!%p971_p0), %v1231_v41 }
  0x25   : > { %1008 = vmatmul.mubr.msk.f32.vlgmr.msra.gmra.mrb[0].mxu0 %vm278_vm1, %v266_v8 }
  0x26   : > { %1022 = vmatprep.mubr.msk.f32.mxu0 (!%p971_p0), %vm1232_vm3, %v1231_v41  ;;  %1021 = vmatpush3.msra.mxu0 (!%p971_p0), %v539_v38 }
  0x27   : > { %1030 = vmatprep.subr.mxu0 (!%p971_p0), %v1231_v41 }
  0xf8   : > { %v348_v10 = vpop.f32.mrb[0].mxu0 }
  0xf9   : > { %v349_v11 = vadd.f32 %v965_v9, %v348_v10  ;;  %v1009_v12 = vpop.f32.mrb[1].mxu0 }
  0xfb   : > { %446 = vrot.lane.b32.xlu1 %v349_v11, %s1229_s13  ;;  %354 = vrot.lane.b32.xlu0 %v349_v11, %s1230_s17  ;;  %v352_v14 = vmul.f32 0.35355338, %v349_v11 }
 0x16d   : > { %v355_v13 = vpop.permute.xlu0 %354  ;;  %v447_v15 = vpop.permute.xlu1 %446 }
 0x16e   : > { %1011 = vmatpush3.xpose.msk.msra.mxu1 %vm356_vm2, %v355_v13 }
 0x16f   : > { %1015 = vmatprep.subr.mxu1 %v1228_v1 }
 0x171   : > { %1013 = vmatmul.mubr.msk.f32.vlgmr.msra.gmra.mrb[0].mxu1 %vm356_vm2, %v352_v14 }
 0x172   : > { %1016 = vmatpush3.msra.mxu1 %v447_v15  ;;  %1017 = vmatprep.mubr.msk.f32.mxu1 %vm1227_vm0, %v1228_v1 }
 0x173   : > { %1025 = vmatprep.subr.mxu1 (!%p971_p0), %v1231_v41 }
 0x244   : > { %v428_v16 = vpop.f32.mrb[0].mxu1 }
 0x245   : > { %v1014_v17 = vpop.f32.mrb[1].mxu1  ;;  %v432_v18 = vsel %vm356_vm2, %v428_v16, -inf }
 0x246   : > { %433 = vmax.xlane.f32.xlu0 %v432_v18 }
 0x2d3   : > { %v434_v19 = vpop.xlane.xlu0 %433 }
 0x2d4   : > { %v438_v20 = vsub.f32 %v428_v16, %v434_v19  ;;  %v435_v24 = vsub.f32 -inf, %v434_v19 }
 0x2d6   : > { %v439_v21 = vmul.f32 1.442695, %v438_v20  ;;  %v436_v25 = vmul.f32 1.442695, %v435_v24 }
 0x2d8   : > { %1124 = vpow2.f32 %v439_v21 }
 0x2d9   : > { %1126 = vpow2.f32 %v436_v25 }
 0x2e2   : > { %v1125_v22 = vpop.eup %1124 }
 0x2e3   : > { %1018 = vmatmul.mubr.msk.f32.vlgmr.msra.gmra.mrb[2].mxu1 %vm356_vm2, %v1125_v22  ;;  %v442_v23 = vsel %vm356_vm2, %v1125_v22, 0.0  ;;  %v1127_v26 = vpop.eup %1126 }
 0x2e4   : > { %443 = vadd.xlane.f32.xlu1 %v442_v23  ;;  %v441_v28 = vmul.f32 0.0, %v1127_v26  ;;  %1026 = vmatpush3.msra.mxu1 (!%p971_p0), %v536_v40 }
 0x2e5   : > { %1027 = vmatprep.mubr.msk.f32.mxu1 (!%p971_p0), %vm1232_vm3, %v1231_v41  ;;  %1035 = vmatprep.subr.mxu1 (!%p971_p0), %v1231_v41 }
 0x371   : > { %v444_v27 = vpop.xlane.xlu1 %443 }
 0x372   : > { %v445_v29 = vadd.f32 %v444_v27, %v441_v28 }
 0x374   : > { %1128 = vrcp.f32 %v445_v29 }
 0x37e   : > { %v1129_v30 = vpop.eup %1128 }
 0x37f   : > { %v524_v31 = vmul.f32 %v1129_v30, %v445_v29 }
 0x381   : > { %v525_v32 = vsub.f32 2.0, %v524_v31 }
 0x383   : > { %v526_v35 = vmul.f32 %v1129_v30, %v525_v32 }
 0x3b5   : > { %534 = sbr.rel (%p971_p0) target bundleno = 1186 (0x4a2), region = 44 }
 0x3b6   : > { %v518_v33 = vpop.f32.mrb[2].mxu1 }
 0x3b7   : > { %v522_v34 = vadd.f32 %v518_v33, %v441_v28  ;;  %v1019_v36 = vpop.f32.mrb[3].mxu1 }
 0x3b9   : > { %v527_v37 = vmul.f32 %v526_v35, %v522_v34 }
 0x3bb   : > { %530 = vst.msk [vmem:[%s529_s26] sm:$0xff] %vm356_vm2, %v527_v37 }
 0x3c2   : > { %v538_v39 = vld [vmem:[#allocation2 + $0x1] ss:$4 sm:$0xff]  ;;  %v535_v42 = vld [vmem:[#allocation2] ss:$4 sm:$0xff]  ;;  %v687_v45 = vld [vmem:[#allocation2 + $0x2] ss:$4 sm:$0xff] }
 0x3c3   : > { %1023 = vmatmul.mubr.msk.f32.vlgmr.msra.gmra.mrb[0].mxu0 %vm356_vm2, %v538_v39  ;;  %1028 = vmatmul.mubr.msk.f32.vlgmr.msra.gmra.mrb[0].mxu1 %vm356_vm2, %v535_v42  ;;  %v764_v46 = vld [vmem:[#allocation2 + $0x3] ss:$4 sm:$0xff] }
 0x3c4   : > { %1031 = vmatpush3.msra.mxu0 %v688_v43  ;;  %1032 = vmatprep.mubr.msk.f32.mxu0 %vm1232_vm3, %v1231_v41 }
 0x3c5   : > { %1036 = vmatpush3.msra.mxu1 %v765_v44  ;;  %1037 = vmatprep.mubr.msk.f32.mxu1 %vm1232_vm3, %v1231_v41 }
 0x3c7   : > { %1033 = vmatmul.mubr.msk.f32.vlgmr.msra.gmra.mrb[2].mxu0 %vm356_vm2, %v687_v45  ;;  %1038 = vmatmul.mubr.msk.f32.vlgmr.msra.gmra.mrb[2].mxu1 %vm356_vm2, %v764_v46 }
 0x496   : > { %v609_v47 = vpop.f32.mrb[0].mxu0  ;;  %v682_v49 = vpop.f32.mrb[0].mxu1 }
 0x497   : > { %v1024_v48 = vpop.f32.mrb[1].mxu0  ;;  %v683_v50 = vadd.f32 %v682_v49, %v609_v47  ;;  %v1029_v51 = vpop.f32.mrb[1].mxu1 }
 0x49a   : > { %v758_v52 = vpop.f32.mrb[2].mxu0  ;;  %v835_v55 = vpop.f32.mrb[2].mxu1 }
 0x49b   : > { %v762_v53 = vadd.f32 %v758_v52, %v683_v50  ;;  %v1034_v54 = vpop.f32.mrb[3].mxu0  ;;  %v1039_v58 = vpop.f32.mrb[3].mxu1 }
 0x49d   : > { %v839_v57 = vadd.f32 %v835_v55, %v762_v53 }
 0x49f   : > { %v847_v59 = vadd.f32 %v976_v56, %v839_v57 }
 0x4a1   : > { %848 = vst.msk [vmem:[%s253_s27] sm:$0xff] %vm278_vm1, %v847_v59 }
 0x4a2 PF: > { %s978_s7 = sshll.u32 %s1212_s22, 7  ;;  %s863_s16 = sshll.u32 %s253_s27, 4  ;;  %s864_s16 = int_to_ptr.vmem [resolvable:$true] %s863_s16 }
 0x4a3   : > { %s1394_s14 = scalar_lea.hbm %s1450_s5, %s978_s7  ;;  %s850_s21 = scalar_lea.sflag [#allocation4], %s251_s10 }
 0x4a4   : > { %s1130_s13 = scalar_lea.vmem %s864_s16, 128  ;;  %s1233_s17 = smov [#allocation3]  }
 0x4a5   : > { %p1131_p1 = scmp.ne.s32.totalorder %s864_s16, %s1130_s13  ;;  %s1134_s12 = sshll.u32 %s1233_s17, 4  ;;  %s1135_s12 = int_to_ptr.vmem [resolvable:$false] %s1134_s12 }
 0x4a6   : > { %s1136_s26 = scalar_lea.vmem %s1135_s12, 256  ;;  %p1137_p5 = scmp.lt.s32.totalorder %s864_s16, %s1135_s12 }
 0x4a7   : > { %p1132_p2 = pnand %p1131_p1, %p1313_p3  ;;  %p1138_p6 = scmp.lt.s32.totalorder %s1136_s26, %s1130_s13 }
 0x4a9   : > { %p1133_p4 = pneg %p1132_p2  ;;  %p1139_p7 = por %p1138_p6, %p1137_p5 }
 0x4ab   : > { %p1140_p8 = pnand %p1139_p7, %p1133_p4 }
 0x4ad   : > { %1143 = shalt.err (!%p1140_p8)
}
 0x4ae   : > { %s1144_s22 = scalar_lea.hbm %s1394_s14, 128  ;;  %s1148_s27 = scalar_lea.hbm %s1450_s5, 256 }
 0x4af   : > { %p1145_p10 = scmp.ne.s32.totalorder %s1394_s14, %s1144_s22  ;;  %p1149_p13 = scmp.lt.u32.totalorder %s1394_s14, %s1450_s5 }
 0x4b0   : > { %p1150_p0 = scmp.lt.u32.totalorder %s1148_s27, %s1144_s22  ;;  %p1152_p2 = scmp.lt.u32.totalorder %s1144_s22, %s1394_s14 }
 0x4b1   : > { %p1146_p11 = pnand %p1145_p10, %p1313_p3 }
 0x4b2   : > { %p1151_p1 = por %p1150_p0, %p1149_p13 }
 0x4b3   : > { %p1147_p12 = pneg %p1146_p11 }
 0x4b4   : > { %p1153_p4 = por %p1152_p2, %p1151_p1 }
 0x4b6   : > { %p1154_p5 = pnand %p1153_p4, %p1147_p12 }
 0x4b8   : > { %1157 = shalt.err (!%p1154_p5)
}
 0x4b9   : > { %1046 = dma.vmem_to_hbm [thread:$0]  (%p1313_p3), %s864_s16, 128, %s1394_s14, %s850_s21  }
 0x4ba PF: > { %p1052_p6 = scmp.ge.s32.totalorder %s1224_s25, 2  ;;  %s875_s15 = sand.u32 1, %s1196_s18  }
 0x4bb   : > { %s876_s13 = scalar_lea.sflag [#allocation4], %s875_s15 }
 0x4bc   : > { %p1049_p7 = pnand %p1052_p6, %p1323_p9 }
 0x4be   : > { %1191 = dma.done.wait (!%p1049_p7), %s876_s13, 128  }
 0x4bf   : > { %1193 = vsyncadd (!%p1049_p7), %s876_s13, 4294967168  ;;  %s18_s25 = sadd.s32 1, %s1224_s25   ;;  %s1453_s18 = smov %s1200_s19 }
 0x4c0   : > { %p15_p8 = scmp.ge.s32.totalorder %s18_s25, 10   ;;  %s1454_s19 = smov %s1204_s20 }
 0x4c1   : > { %s1455_s20 = smov %s1331_s9  ;;  %s1456_s21 = smov %s1216_s23 }
 0x4c2   : > { %s1457_s22 = smov %s1220_s24  ;;  %s1458_s23 = smov %s1461_s28 }
 0x4c3   : > { %s1459_s24 = smov %s1465_s29  ;;  %17 = sbr.rel (!%p15_p8) target bundleno = 5 (0x5), region = 89 }
 0x4ca   :  { %881 = vsyncpa [#allocation4], 1 }
 0x4cb   :  { %883 = vsyncpa [#allocation4 + $0x1], 1 }

</bundles_post_ra>
